<compile_context>
chip_gen: v6e
topology: v6e:2x2x1
jax: 0.10.0
libtpu: 0.0.40
codegen_flags: <defaults>
</compile_context>

<pallas_src>
import functools

import jax
import jax.numpy as jnp
from jax.experimental import pallas as pl
from jax.experimental.pallas import tpu as pltpu

_LANE = 128
_SUBLANE = 8
_TB_CAP = 4096                          # max batch-tile rows (swept 2048-8192)
_VMEM_LIMIT_BYTES = 48 * 1024 * 1024    # explicit limit; fits v7x's 64 MiB VMEM
_VMEM_TILE_BUDGET = 36 * 1024 * 1024    # tile-sizing budget (headroom for
                                        # compiler-internal scratch)


def _round_up(x, m):
    return (x + m - 1) // m * m


def _mlp_kernel(x_ref, w1_ref, b1_ref, w2_ref, b2_ref, o_ref, *, apply_softmax):
    # fc1: (TB, D_in) @ (D_in, H_pad) on the MXU, f32 accumulation.
    h = jnp.dot(x_ref[...], w1_ref[...], preferred_element_type=jnp.float32)
    # Bias folded into the ReLU -> single VPU pass (runs on the f32 acc, so it
    # is identical on v5e which has no bf16 VPU).
    h = jnp.maximum(h + b1_ref[...], 0.0)
    # fc2: feed the MXU in the weights' native dtype (no-op for f32 params,
    # bf16-native for bf16 params), accumulate in f32.
    y = jnp.dot(h.astype(w2_ref.dtype), w2_ref[...],
                preferred_element_type=jnp.float32)
    y = y + b2_ref[...]
    if apply_softmax:
        # All output columns are real classes (no column padding anymore).
        # Exact division so rows sum to 1 (matches jax.nn.softmax).
        # NOTE: on a partial last batch tile, out-of-bounds rows are computed
        # on garbage input (possibly producing inf/NaN lanes) and then
        # discarded by Pallas -- never read o_ref back under that assumption.
        m = jnp.max(y, axis=1, keepdims=True)
        e = jnp.exp(y - m)
        y = e / jnp.sum(e, axis=1, keepdims=True)
    o_ref[...] = y.astype(o_ref.dtype)


def pad_params(w1, b1, w2, b2):
    """Zero-pad hidden_dim up to a multiple of 128 lanes.

    Numerically exact (ReLU(0 + 0) = 0 and the padded w2 rows are 0).  Call
    this ONCE at parameter-init time so the forward pass never re-pads weights
    (a per-call pad would be an extra XLA op + an HBM pass over the weights).
    """
    hidden = w1.shape[1]
    hp = _round_up(hidden, _LANE)
    if hp == hidden:
        return w1, b1, w2, b2
    pad = hp - hidden
    return (jnp.pad(w1, ((0, 0), (0, pad))),
            jnp.pad(b1, ((0, 0), (0, pad))),
            jnp.pad(w2, ((0, pad), (0, 0))),
            b2)


def _choose_batch_tile(batch, input_dim, hidden_pad, output_dim, item_bytes):
    """Largest batch tile that fits the VMEM budget (cap _TB_CAP)."""
    # x/out tiles are double-buffered by the pipeline; weights are single-
    # buffered (pl.Buffered(1)); the (tb, hidden_pad)/(tb, out) intermediates
    # are f32.
    per_row = (2 * input_dim * item_bytes          # x tile (double-buffered)
               + 2 * output_dim * item_bytes       # out tile (double-buffered)
               + hidden_pad * 4 + output_dim * 4)  # f32 intermediates
    weight_bytes = (input_dim * hidden_pad + hidden_pad
                    + hidden_pad * output_dim + output_dim) * item_bytes
    avail = max(_VMEM_TILE_BUDGET - weight_bytes, 256 * per_row)
    tb = min(batch, _TB_CAP, avail // per_row)
    if tb >= batch:
        return batch  # single tile == full extent: no (8,128) divisibility rule
    tb = max(_SUBLANE, (tb // _SUBLANE) * _SUBLANE)
    # v7x: the "parallel" batch axis shards across 2 TensorCores -- keep the
    # tile count even so neither core idles for a whole tile.
    n = -(-batch // tb)
    if n % 2 == 1:
        n += 1
        tb = max(_SUBLANE, _round_up(-(-batch // n), _SUBLANE))
    return tb


def sentiment_mlp_forward(x, w1, b1, w2, b2, apply_softmax=False):
    """Fused forward pass of SentimentClassifierMLP.

    Args:
      x:  (batch, input_dim)
      w1: (input_dim, hidden_pad)   b1: (1, hidden_pad)   (prefer pad_params)
      w2: (hidden_pad, output_dim)  b2: (1, output_dim)
    Returns:
      (batch, output_dim), dtype of x.
    """
    batch, input_dim = x.shape
    hidden_pad = w1.shape[1]
    output_dim = w2.shape[1]

    if hidden_pad % _LANE != 0:
        # Fallback: pad lazily.  Prefer calling pad_params() once at init.
        w1, b1, w2, b2 = pad_params(w1, b1, w2, b2)
        hidden_pad = w1.shape[1]

    item_bytes = x.dtype.itemsize
    tb = _choose_batch_tile(batch, input_dim, hidden_pad, output_dim, item_bytes)
    grid = (pl.cdiv(batch, tb),)

    # TODO(synk): for very large input_dim (e.g. 10k-dim one-hot / TF-IDF
    # features) add a K grid axis over input_dim (marked "arbitrary", last)
    # with an f32 accumulator scratch + pl.when init/finalize instead of
    # keeping w1 fully VMEM-resident.

    kernel = functools.partial(_mlp_kernel, apply_softmax=apply_softmax)

    def _weight_spec(shape):
        # Constant index_map -> VMEM-resident across grid steps; single-buffer
        # so the pipeline doesn't double the weights' VMEM footprint.
        return pl.BlockSpec(shape, lambda i: (0, 0),
                            pipeline_mode=pl.Buffered(1))

    return pl.pallas_call(
        kernel,
        out_shape=jax.ShapeDtypeStruct((batch, output_dim), x.dtype),
        grid=grid,
        in_specs=[
            # x tiled along batch -> software-pipelined HBM->VMEM DMAs.
            pl.BlockSpec((tb, input_dim), lambda i: (i, 0)),
            _weight_spec((input_dim, hidden_pad)),
            _weight_spec((1, hidden_pad)),
            _weight_spec((hidden_pad, output_dim)),
            _weight_spec((1, output_dim)),
        ],
        # Unpadded output block: last dim equals the full array dim (legal);
        # masked vst but ~32x less writeback than a 128-lane padded slab and
        # no wrapper-side slice / extra launch.
        out_specs=pl.BlockSpec((tb, output_dim), lambda i: (i, 0)),
        compiler_params=pltpu.CompilerParams(
            # Independent batch tiles -> shard across v7x's 2 TensorCores
            # (neutral on single-TC v5e/v6e).
            dimension_semantics=("parallel",),
            vmem_limit_bytes=_VMEM_LIMIT_BYTES),
    )(x, w1, b1, w2, b2)


def init_params(key, input_dim, hidden_dim, output_dim, dtype=jnp.float32):
    """Deterministic init mimicking torch.nn.Linear's U(-1/sqrt(fan_in), ...)."""
    k1, k2, k3, k4 = jax.random.split(key, 4)
    bound1 = 1.0 / jnp.sqrt(input_dim)
    bound2 = 1.0 / jnp.sqrt(hidden_dim)
    w1 = jax.random.uniform(k1, (input_dim, hidden_dim), dtype, -bound1, bound1)
    b1 = jax.random.uniform(k2, (1, hidden_dim), dtype, -bound1, bound1)
    w2 = jax.random.uniform(k3, (hidden_dim, output_dim), dtype, -bound2, bound2)
    b2 = jax.random.uniform(k4, (1, output_dim), dtype, -bound2, bound2)
    return w1, b1, w2, b2


def _reference(x, w1, b1, w2, b2, apply_softmax):
    h = jnp.maximum(x @ w1 + b1, 0.0)
    y = h @ w2 + b2
    return jax.nn.softmax(y, axis=1) if apply_softmax else y


if __name__ == "__main__":
    # Small shapes consistent with the module: x_in is (batch, input_dim).
    batch, input_dim, hidden_dim, output_dim = 2, 64, 32, 4

    key = jax.random.PRNGKey(0)
    kx, kp = jax.random.split(key)
    x = jax.random.normal(kx, (batch, input_dim), dtype=jnp.float32)
    w1, b1, w2, b2 = init_params(kp, input_dim, hidden_dim, output_dim)
    # Pre-pad hidden_dim once at init time (hoisted out of the forward pass).
    pw1, pb1, pw2, pb2 = pad_params(w1, b1, w2, b2)

    # Forward pass without softmax (as used with cross-entropy losses).
    logits = sentiment_mlp_forward(x, pw1, pb1, pw2, pb2, apply_softmax=False)
    # Forward pass with softmax.
    probs = sentiment_mlp_forward(x, pw1, pb1, pw2, pb2, apply_softmax=True)
    jax.block_until_ready((logits, probs))

    ref_logits = _reference(x, w1, b1, w2, b2, False)
    ref_probs = _reference(x, w1, b1, w2, b2, True)
    assert logits.shape == (batch, output_dim)
    assert jnp.allclose(logits, ref_logits, atol=1e-5, rtol=1e-5)
    assert jnp.allclose(probs, ref_probs, atol=1e-5, rtol=1e-5)

    # Larger batch exercises the tiled ("parallel") grid path, including a
    # partial last tile and the even-tile-count heuristic.
    big = 8232  # not a multiple of the chosen tile
    xb = jax.random.normal(jax.random.PRNGKey(1), (big, input_dim),
                           dtype=jnp.float32)
    big_logits = sentiment_mlp_forward(xb, pw1, pb1, pw2, pb2,
                                       apply_softmax=False)
    jax.block_until_ready(big_logits)
    assert big_logits.shape == (big, output_dim)
    assert jnp.allclose(big_logits, _reference(xb, w1, b1, w2, b2, False),
                        atol=1e-4, rtol=1e-4)

    # bf16 data-movement path: halves x-read / out-write HBM bytes while the
    # MXU still accumulates in f32.
    xbf = xb.astype(jnp.bfloat16)
    bw1, bb1, bw2, bb2 = (p.astype(jnp.bfloat16) for p in (pw1, pb1, pw2, pb2))
    bf_logits = sentiment_mlp_forward(xbf, bw1, bb1, bw2, bb2,
                                      apply_softmax=False)
    jax.block_until_ready(bf_logits)
    assert bf_logits.shape == (big, output_dim)
    assert jnp.allclose(bf_logits.astype(jnp.float32),
                        _reference(xb, w1, b1, w2, b2, False),
                        atol=0.1, rtol=0.1)

    print("KERNEL_OK")
</pallas_src>

<mosaic_0001>
module attributes {stable_mosaic.version = 11 : i64} {
  func.func @_mlp_kernel(%arg0: i32, %arg1: memref<2x64xf32, #tpu.memory_space<vmem>>, %arg2: memref<64x128xf32, #tpu.memory_space<vmem>>, %arg3: memref<1x128xf32, #tpu.memory_space<vmem>>, %arg4: memref<128x4xf32, #tpu.memory_space<vmem>>, %arg5: memref<1x4xf32, #tpu.memory_space<vmem>>, %arg6: memref<2x4xf32, #tpu.memory_space<vmem>>) attributes {dimension_semantics = [#tpu.dimension_semantics<parallel>], iteration_bounds = array<i64: 1>, scalar_prefetch = 0 : i64, scratch_operands = 0 : i64, tpu.core_type = #tpu.core_type<tc>, window_params = [{transform_indices = @transform_0, window_bounds = array<i64: 2, 64>}, {pipeline_mode = #tpu.pipeline_mode<synchronous>, transform_indices = @transform_1, window_bounds = array<i64: 64, 128>}, {pipeline_mode = #tpu.pipeline_mode<synchronous>, transform_indices = @transform_2, window_bounds = array<i64: 1, 128>}, {pipeline_mode = #tpu.pipeline_mode<synchronous>, transform_indices = @transform_3, window_bounds = array<i64: 128, 4>}, {pipeline_mode = #tpu.pipeline_mode<synchronous>, transform_indices = @transform_4, window_bounds = array<i64: 1, 4>}, {transform_indices = @transform_5, window_bounds = array<i64: 2, 4>}]} {
    %c0 = arith.constant 0 : index
    %c0_0 = arith.constant 0 : index
    %0 = vector.load %arg1[%c0, %c0_0] : memref<2x64xf32, #tpu.memory_space<vmem>>, vector<2x64xf32>
    %c0_1 = arith.constant 0 : index
    %c0_2 = arith.constant 0 : index
    %1 = vector.load %arg2[%c0_1, %c0_2] : memref<64x128xf32, #tpu.memory_space<vmem>>, vector<64x128xf32>
    %cst = arith.constant dense<0.000000e+00> : vector<2x128xf32>
    %2 = tpu.matmul %0, %1, %cst {dimension_numbers = #tpu.dot_dimension_numbers<[1], [0], [0], [1], [0, 0, 1, 1], [], []>} : vector<2x64xf32>, vector<64x128xf32>, vector<2x128xf32> -> vector<2x128xf32>
    %c0_3 = arith.constant 0 : index
    %c0_4 = arith.constant 0 : index
    %3 = vector.load %arg3[%c0_3, %c0_4] : memref<1x128xf32, #tpu.memory_space<vmem>>, vector<1x128xf32>
    %4 = vector.broadcast %3 : vector<1x128xf32> to vector<2x128xf32>
    %5 = arith.addf %2, %4 : vector<2x128xf32>
    %cst_5 = arith.constant 0.000000e+00 : f32
    %6 = vector.broadcast %cst_5 : f32 to vector<2x128xf32>
    %7 = arith.maximumf %5, %6 : vector<2x128xf32>
    %c0_6 = arith.constant 0 : index
    %c0_7 = arith.constant 0 : index
    %8 = vector.load %arg4[%c0_6, %c0_7] : memref<128x4xf32, #tpu.memory_space<vmem>>, vector<128x4xf32>
    %cst_8 = arith.constant dense<0.000000e+00> : vector<2x4xf32>
    %9 = tpu.matmul %7, %8, %cst_8 {dimension_numbers = #tpu.dot_dimension_numbers<[1], [0], [0], [1], [0, 0, 1, 1], [], []>} : vector<2x128xf32>, vector<128x4xf32>, vector<2x4xf32> -> vector<2x4xf32>
    %c0_9 = arith.constant 0 : index
    %c0_10 = arith.constant 0 : index
    %10 = vector.load %arg5[%c0_9, %c0_10] : memref<1x4xf32, #tpu.memory_space<vmem>>, vector<1x4xf32>
    %11 = vector.broadcast %10 : vector<1x4xf32> to vector<2x4xf32>
    %12 = arith.addf %9, %11 : vector<2x4xf32>
    %c0_11 = arith.constant 0 : index
    %c0_12 = arith.constant 0 : index
    %13 = vector.load %arg6[%c0_11, %c0_12] : memref<2x4xf32, #tpu.memory_space<vmem>>, vector<2x4xf32>
    tpu.vector_store %arg6[%c0_11, %c0_12], %12 {strides = array<i32>} : memref<2x4xf32, #tpu.memory_space<vmem>>, vector<2x4xf32>,
    return
  }
  func.func @transform_0(%arg0: i32) -> (i32, i32) {
    %c0_i32 = arith.constant 0 : i32
    %c0_i32_0 = arith.constant 0 : i32
    return %arg0, %c0_i32 : i32, i32
  }
  func.func @transform_1(%arg0: i32) -> (i32, i32) {
    %c0_i32 = arith.constant 0 : i32
    %c0_i32_0 = arith.constant 0 : i32
    %c0_i32_1 = arith.constant 0 : i32
    return %c0_i32, %c0_i32_0 : i32, i32
  }
  func.func @transform_2(%arg0: i32) -> (i32, i32) {
    %c0_i32 = arith.constant 0 : i32
    %c0_i32_0 = arith.constant 0 : i32
    %c0_i32_1 = arith.constant 0 : i32
    return %c0_i32, %c0_i32_0 : i32, i32
  }
  func.func @transform_3(%arg0: i32) -> (i32, i32) {
    %c0_i32 = arith.constant 0 : i32
    %c0_i32_0 = arith.constant 0 : i32
    %c0_i32_1 = arith.constant 0 : i32
    return %c0_i32, %c0_i32_0 : i32, i32
  }
  func.func @transform_4(%arg0: i32) -> (i32, i32) {
    %c0_i32 = arith.constant 0 : i32
    %c0_i32_0 = arith.constant 0 : i32
    %c0_i32_1 = arith.constant 0 : i32
    return %c0_i32, %c0_i32_0 : i32, i32
  }
  func.func @transform_5(%arg0: i32) -> (i32, i32) {
    %c0_i32 = arith.constant 0 : i32
    %c0_i32_0 = arith.constant 0 : i32
    return %arg0, %c0_i32 : i32, i32
  }
}

</mosaic_0001>

<bundles_post_ra>
// kernel: tpu_custom_call.1
= control target key start
LH: loop header
LB: loop body
LE: loop exit
PB: predicated region body
PF: predicated region fallthrough
CT: control target
= control target key end

     0   :  { %v329_v1 = vmov 0.0   ;;  %vm330_vm0 = vmmov 0   ;;  %s472_s0 = inlined_call_operand.vmem [shape: f32[2,64], index: 0, kind: input, shape index: {}]   ;;  %s473_s1 = inlined_call_operand.vmem [shape: f32[64,128], index: 1, kind: input, shape index: {}]   ;;  %s474_s2 = inlined_call_operand.vmem [shape: f32[1,128], index: 2, kind: input, shape index: {}]   ;;  %s475_s3 = inlined_call_operand.vmem [shape: f32[128,4], index: 3, kind: input, shape index: {}]   ;;  %s476_s4 = inlined_call_operand.vmem [shape: f32[1,4], index: 4, kind: input, shape index: {}]   ;;  %s477_s5 = inlined_call_operand.hbm [shape: f32[2,4], index: 5, kind: output, shape index: {}]  }
   0x1   :  { %v29_v0 = vld [vmem:[%s473_s1 + $0x38] sm:$0xff]  ;;  %250 = vmatprep.subr.mxu0 %v329_v1  ;;  %v28_v2 = vld [vmem:[%s473_s1 + $0x30] sm:$0xff]  ;;  %266 = vmatprep.mubr.msk.f32.mxu0 %vm330_vm0, %v329_v1  ;;  %v27_v3 = vld [vmem:[%s473_s1 + $0x28] sm:$0xff] }
   0x2   :  { %251 = vmatpush3.msra.mxu0 %v29_v0  ;;  %269 = vmatprep.subr.mxu1 %v329_v1  ;;  %v127_v4 = vld [vmem:[%s475_s3 + $0x78] sm:$0xff]  ;;  %v126_v5 = vld [vmem:[%s475_s3 + $0x70] sm:$0xff]  ;;  %v26_v6 = vld [vmem:[%s473_s1 + $0x20] sm:$0xff] }
   0x3   :  { %252 = vmatprep.subr.mxu0 %v329_v1  ;;  %301 = vmatprep.mubr.msk.f32.mxu1 %vm330_vm0, %v329_v1  ;;  %v125_v7 = vld [vmem:[%s475_s3 + $0x68] sm:$0xff]  ;;  %v25_v8 = vld [vmem:[%s473_s1 + $0x18] sm:$0xff]  ;;  %v124_v9 = vld [vmem:[%s475_s3 + $0x60] sm:$0xff] }
   0x4   :  { %253 = vmatpush3.msra.mxu0 %v28_v2  ;;  %270 = vmatpush3.msra.mxu1 %v127_v4 }
   0x5   :  { %254 = vmatprep.subr.mxu0 %v329_v1  ;;  %271 = vmatprep.subr.mxu1 %v329_v1 }
   0x6   :  { %255 = vmatpush3.msra.mxu0 %v27_v3  ;;  %272 = vmatpush3.msra.mxu1 %v126_v5 }
   0x7   :  { %256 = vmatprep.subr.mxu0 %v329_v1  ;;  %273 = vmatprep.subr.mxu1 %v329_v1 }
   0x8   :  { %10 = vsyncpa [#allocation3], 0  ;;  %257 = vmatpush3.msra.mxu0 %v26_v6  ;;  %274 = vmatpush3.msra.mxu1 %v125_v7  ;;  %v24_v10 = vld [vmem:[%s473_s1 + $0x10] sm:$0xff]  ;;  %v123_v11 = vld [vmem:[%s475_s3 + $0x58] sm:$0xff]  ;;  %vm37_vm1 = vcmask 523264   ;;  %s331_s20 = smov [#allocation2]  }
   0x9   :  { %258 = vmatprep.subr.mxu0 %v329_v1  ;;  %275 = vmatprep.subr.mxu1 %v329_v1  ;;  %v23_v12 = vld [vmem:[%s473_s1 + $0x8] sm:$0xff]  ;;  %v122_v13 = vld [vmem:[%s475_s3 + $0x50] sm:$0xff]  ;;  %v22_v14 = vld [vmem:[%s473_s1] sm:$0xff]  ;;  %s213_s21 = sshll.u32 %s331_s20, 4  ;;  %vm205_vm2 = vcmask 25600   ;;  %s214_s21 = int_to_ptr.vmem [resolvable:$true] %s213_s21 }
   0xa   :  { %259 = vmatpush3.msra.mxu0 %v25_v8  ;;  %276 = vmatpush3.msra.mxu1 %v124_v9  ;;  %v121_v15 = vld [vmem:[%s475_s3 + $0x48] sm:$0xff]  ;;  %v21_v16 = vld [vmem:[%s472_s0] sm:$0x3]  ;;  %v119_v18 = vld [vmem:[%s475_s3 + $0x38] sm:$0xff]  ;;  %p312_p1 = scmp.lt.s32.totalorder %s214_s21, %s214_s21 }
   0xb   :  { %260 = vmatprep.subr.mxu0 %v329_v1  ;;  %277 = vmatprep.subr.mxu1 %v329_v1  ;;  %v120_v17 = vld [vmem:[%s475_s3 + $0x40] sm:$0xff]  ;;  %v118_v19 = vld [vmem:[%s475_s3 + $0x30] sm:$0xff]  ;;  %v117_v20 = vld [vmem:[%s475_s3 + $0x28] sm:$0xff] }
   0xc   :  { %261 = vmatpush3.msra.mxu0 %v24_v10  ;;  %278 = vmatpush3.msra.mxu1 %v123_v11  ;;  %v116_v21 = vld [vmem:[%s475_s3 + $0x20] sm:$0xff]  ;;  %v115_v22 = vld [vmem:[%s475_s3 + $0x18] sm:$0xff]  ;;  %v114_v23 = vld [vmem:[%s475_s3 + $0x10] sm:$0xff] }
   0xd   :  { %262 = vmatprep.subr.mxu0 %v329_v1  ;;  %279 = vmatprep.subr.mxu1 %v329_v1  ;;  %v113_v24 = vld [vmem:[%s475_s3 + $0x8] sm:$0xff]  ;;  %v112_v25 = vld [vmem:[%s475_s3] sm:$0xff]  ;;  %s307_s3 = scalar_lea.vmem %s214_s21, 32 }
   0xe   :  { %263 = vmatpush3.msra.mxu0 %v23_v12  ;;  %280 = vmatpush3.msra.mxu1 %v122_v13  ;;  %v221_v26 = vld [vmem:[%s474_s2] ss:$0 sm:$0xff]  ;;  %p308_p0 = scmp.ne.s32.totalorder %s214_s21, %s307_s3  ;;  %p313_p2 = scmp.lt.s32.totalorder %s307_s3, %s307_s3 }
   0xf   :  { %264 = vmatprep.subr.mxu0 %v329_v1  ;;  %281 = vmatprep.subr.mxu1 %v329_v1  ;;  %v223_v31 = vld [vmem:[%s476_s4] ss:$0 sm:$0xff] }
  0x10   :  { %265 = vmatpush3.msra.mxu0 %v22_v14  ;;  %282 = vmatpush3.msra.mxu1 %v121_v15  ;;  %p314_p3 = por %p313_p2, %p312_p1 }
  0x11   :  { %267 = vmatmul.mubr.msk.f32.vlgmr.msra.gmra.mxu0 %vm37_vm1, %v21_v16  ;;  %283 = vmatprep.subr.mxu1 %v329_v1 }
  0x12   :  { %284 = vmatpush3.msra.mxu1 %v120_v17  ;;  %p315_p4 = pnand %p314_p3, %p308_p0 }
  0x13   :  { %285 = vmatprep.subr.mxu1 %v329_v1 }
  0x14   :  { %286 = vmatpush3.msra.mxu1 %v119_v18 }
  0x15   :  { %287 = vmatprep.subr.mxu1 %v329_v1 }
  0x16   :  { %288 = vmatpush3.msra.mxu1 %v118_v19 }
  0x17   :  { %289 = vmatprep.subr.mxu1 %v329_v1 }
  0x18   :  { %290 = vmatpush3.msra.mxu1 %v117_v20 }
  0x19   :  { %291 = vmatprep.subr.mxu1 %v329_v1 }
  0x1a   :  { %292 = vmatpush3.msra.mxu1 %v116_v21 }
  0x1b   :  { %293 = vmatprep.subr.mxu1 %v329_v1 }
  0x1c   :  { %294 = vmatpush3.msra.mxu1 %v115_v22 }
  0x1d   :  { %295 = vmatprep.subr.mxu1 %v329_v1 }
  0x1e   :  { %296 = vmatpush3.msra.mxu1 %v114_v23 }
  0x1f   :  { %297 = vmatprep.subr.mxu1 %v329_v1 }
  0x20   :  { %298 = vmatpush3.msra.mxu1 %v113_v24 }
  0x21   :  { %299 = vmatprep.subr.mxu1 %v329_v1 }
  0x22   :  { %300 = vmatpush3.msra.mxu1 %v112_v25 }
  0xd1   :  { %v107_v27 = vpop.f32.mrf.mxu0 }
  0xd2   :  { %v108_v28 = vadd.f32 %v221_v26, %v107_v27 }
  0xd3   :  { %v268_v29 = vpop.f32.mrf.mxu0 }
  0xd4   :  { %v111_v30 = vmax.f32 %v108_v28, 0.0 }
  0xd6   :  { %302 = vmatmul.mubr.f32.vlgmr.msra.gmra.mxu1 %v111_v30 }
 0x196   :  { %v201_v32 = vpop.f32.mrf.mxu1 }
 0x197   :  { %v202_v33 = vadd.f32 %v223_v31, %v201_v32 }
 0x198   :  { %v303_v34 = vpop.f32.mrf.mxu1 }
 0x199   :  { %206 = vst.msk [vmem:[#allocation2] sm:$0x3] %vm205_vm2, %v202_v33 }
 0x19a   :  { %318 = shalt.err (!%p315_p4)
}
 0x19b   :  { %216 = dma.vmem_to_hbm [thread:$0]  %s214_s21, 32, %s477_s5, [#allocation3]  }
 0x19c   :  { %327 = dma.done.wait [#allocation3], 32  }
 0x19d   :  { %328 = vsyncadd [#allocation3], 4294967264 }
 0x19e   :  { %220 = vsyncpa [#allocation3], 1 }

</bundles_post_ra>
